<compile_context>
chip_gen: v6e
topology: v6e:2x2x1
jax: 0.10.0
libtpu: 0.0.40
codegen_flags: <defaults>
</compile_context>

<pallas_src>
import jax
import jax.numpy as jnp
from jax.experimental import pallas as pl
from jax.experimental.pallas import tpu as pltpu


def _round_up(x, m):
    return ((x + m - 1) // m) * m


def _make_highway_kernel(grid_n, tn):
    """Kernel closure; grid_n/tn are static tiling constants."""

    def kernel(x_ref, w_ref, b_ref, o_ref):
        # x_ref : [tr, dim]        input row tile (full feature axis, unpadded)
        # w_ref : [dim, 2*half]    fused [Wg_j | Wn_j] column tile, bf16
        # b_ref : [1, 2*half]      fused [bg_j | bn_j] column tile, f32
        # o_ref : [tr, nout]       output tile (nout = dim or tn)
        half = w_ref.shape[-1] // 2     # (padded) per-half width of this column tile
        nout = o_ref.shape[-1]          # valid output columns in this tile

        x = x_ref[...]
        # Single fused MXU matmul: bf16 operands, f32 accumulation.
        pre = jnp.dot(x.astype(jnp.bfloat16), w_ref[...],
                      preferred_element_type=jnp.float32) + b_ref[...]
        pre_g = pre[:, :nout]
        pre_n = pre[:, half:half + nout]

        # sigmoid(z) == 0.5*tanh(0.5*z) + 0.5 : one EUP push (tanh) instead of
        # two (exp + reciprocal); the scale/offset land on the VPU, which has slack.
        gate = 0.5 * jnp.tanh(0.5 * pre_g) + 0.5
        nlin = jnp.tanh(pre_n)
        # TODO(synk): on v6e/v7x an EUP-bound shape could evaluate gate/nlin in bf16;
        # kept f32 here so the same kernel stays optimal/safe on v5e (no bf16 VPU/EUP).

        if grid_n == 1:
            xs = x.astype(jnp.float32)
        else:
            j = pl.program_id(1)
            start = pl.multiple_of(j * tn, 128)
            xs = x_ref[:, pl.ds(start, tn)].astype(jnp.float32)

        # x + gate*(nlin - x): one fewer vmul+vsub than gate*nlin + (1-gate)*x.
        o_ref[...] = (xs + gate * (nlin - xs)).astype(o_ref.dtype)

    return kernel


def _choose_col_tiling(dim, w_block_budget_bytes):
    """Return (tn, grid_n, half): output-column tile, #column tiles, per-half width."""
    if dim % 128 != 0:
        # Pad only the fused weight/bias column halves up to 128 so the gate/nlin
        # slices stay lane-aligned; x / output stay unpadded.
        return dim, 1, _round_up(dim, 128)
    if 4 * dim * dim <= w_block_budget_bytes:       # bf16 fused block = dim * 2*dim * 2B
        return dim, 1, dim
    # N-tiling over output columns; prefer 256-multiples (v6e/v7x MXU), else 128.
    for step in (256, 128):
        t = (dim // step) * step
        while t >= step:
            if dim % t == 0 and 4 * dim * t <= w_block_budget_bytes:
                return t, dim // t, t
            t -= step
    t = 256 if dim % 256 == 0 else 128
    return t, dim // t, t


def fuse_highway_params(wg, bg, wn, bn, *, w_block_budget_bytes=16 << 20):
    """Precompute (ONCE, outside the forward path) the fused bf16 weight / f32 bias.

    wg, wn: [dim, dim], pre-transposed so the kernel computes x @ W (== x @ W_torch^T).
    bg, bn: [dim].
    """
    dim = wg.shape[0]
    assert wg.shape == (dim, dim) and wn.shape == (dim, dim)
    tn, grid_n, half = _choose_col_tiling(dim, w_block_budget_bytes)

    wg = wg.astype(jnp.bfloat16)
    wn = wn.astype(jnp.bfloat16)
    bg = bg.astype(jnp.float32)
    bn = bn.astype(jnp.float32)

    if grid_n == 1:
        pad = half - dim
        w_cat = jnp.concatenate(
            [jnp.pad(wg, ((0, 0), (0, pad))), jnp.pad(wn, ((0, 0), (0, pad)))], axis=1)
        b_cat = jnp.concatenate(
            [jnp.pad(bg, (0, pad)), jnp.pad(bn, (0, pad))]).reshape(1, 2 * half)
    else:
        # Interleaved per-block halves: column block j = [Wg[:, j*tn:(j+1)*tn] | Wn[:, ...]].
        w_cat = jnp.concatenate(
            [wg.reshape(dim, grid_n, tn), wn.reshape(dim, grid_n, tn)], axis=2
        ).reshape(dim, grid_n * 2 * tn)
        b_cat = jnp.concatenate(
            [bg.reshape(grid_n, tn), bn.reshape(grid_n, tn)], axis=1
        ).reshape(1, grid_n * 2 * tn)

    return {"w": w_cat, "b": b_cat, "dim": dim, "tn": tn, "grid_n": grid_n, "half": half}


def highway_forward(x, params, *, tile_rows=None):
    """Highway layer forward. x: [..., dim]; params from fuse_highway_params."""
    dim = params["dim"]
    tn, grid_n, half = params["tn"], params["grid_n"], params["half"]
    w_cat, b_cat = params["w"], params["b"]

    orig_shape = x.shape
    assert orig_shape[-1] == dim
    x2d = x.reshape(-1, dim)
    m = x2d.shape[0]
    out_cols = dim if grid_n == 1 else tn

    # Row tile: multiple of 8 sublanes; target ~8+ grid steps so x/out DMA overlaps
    # compute and v7x megacore has >=4 steps per core.
    if tile_rows is None:
        tile_rows = min(512, max(8, _round_up(pl.cdiv(m, 8), 8)))
    tile_rows = max(8, _round_up(int(tile_rows), 8))

    x_itemsize = jnp.dtype(x.dtype).itemsize
    w_bufs = 1 if grid_n == 1 else 2     # single-buffered when grid-invariant

    def vmem_need(tr):
        return (2 * tr * dim * x_itemsize            # x tiles (double-buffered)
                + 2 * tr * out_cols * x_itemsize     # out tiles (double-buffered)
                + w_bufs * dim * 2 * half * 2        # bf16 fused weight tile(s)
                + w_bufs * 2 * half * 4              # f32 fused bias tile(s)
                + 3 * tr * 2 * half * 4)             # f32 matmul result / activations

    # Generation-aware VMEM ceiling: ~100 MiB on 128 MiB parts (v5e/v6e),
    # stay below ~56 MiB on v7x's 64 MiB VMEM.
    try:
        cap = int(pltpu.get_tpu_info().vmem_capacity_bytes)
    except Exception:
        cap = 64 << 20
    allowed = (100 << 20) if cap >= (100 << 20) else min(cap - (8 << 20), 56 << 20)

    while vmem_need(tile_rows) + (4 << 20) > allowed and tile_rows > 8:
        tile_rows = max(8, _round_up(tile_rows // 2, 8))

    vmem_limit = int(min(max(vmem_need(tile_rows) * 2 + (4 << 20), 32 << 20), allowed))

    grid_m = pl.cdiv(m, tile_rows)   # ragged last row tile is clipped by Pallas

    def _const_spec(shape, index_map):
        # Grid-invariant operand: single-buffer it to halve its VMEM footprint.
        try:
            return pl.BlockSpec(shape, index_map, pipeline_mode=pl.Buffered(1))
        except (TypeError, AttributeError):
            return pl.BlockSpec(shape, index_map)

    if grid_n == 1:
        w_spec = _const_spec((dim, 2 * half), lambda i, j: (0, j))
        b_spec = _const_spec((1, 2 * half), lambda i, j: (0, j))
    else:
        w_spec = pl.BlockSpec((dim, 2 * half), lambda i, j: (0, j))
        b_spec = pl.BlockSpec((1, 2 * half), lambda i, j: (0, j))

    out = pl.pallas_call(
        _make_highway_kernel(grid_n, tn),
        out_shape=jax.ShapeDtypeStruct((m, dim), x.dtype),
        grid_spec=pltpu.PrefetchScalarGridSpec(
            num_scalar_prefetch=0,
            grid=(grid_m, grid_n),
            in_specs=[
                pl.BlockSpec((tile_rows, dim), lambda i, j: (i, 0)),   # x row tile
                w_spec,                                                # fused weight col tile
                b_spec,                                                # fused bias col tile
            ],
            out_specs=pl.BlockSpec((tile_rows, out_cols), lambda i, j: (i, j)),
        ),
        compiler_params=pltpu.CompilerParams(
            dimension_semantics=("parallel", "parallel"),
            vmem_limit_bytes=vmem_limit,
        ),
    )(x2d, w_cat, b_cat)

    return out.reshape(orig_shape)


def highway_layer(x, wg, bg, wn, bn, *, tile_rows=None):
    """One-shot convenience wrapper. Prefer fuse_highway_params + highway_forward
    so the weight fusion is paid once, not per forward call."""
    return highway_forward(x, fuse_highway_params(wg, bg, wn, bn), tile_rows=tile_rows)


def xavier_uniform(key, shape, gain=1.0, dtype=jnp.float32):
    fan_in, fan_out = shape[1], shape[0]   # torch Linear weight is [out, in]
    bound = gain * jnp.sqrt(6.0 / (fan_in + fan_out))
    return jax.random.uniform(key, shape, dtype=dtype, minval=-bound, maxval=bound)


if __name__ == "__main__":
    key = jax.random.PRNGKey(0)
    k_x, k_wg, k_wn = jax.random.split(key, 3)

    batch, seq, dim = 2, 8, 32
    x = jax.random.normal(k_x, (batch, seq, dim), dtype=jnp.float32)

    # Parameter init matching HighwayLayer.__init__:
    #   gate_proj: xavier_uniform weight, bias = -1 ; nlin_proj: xavier_uniform weight, bias = 0
    wg_torch = xavier_uniform(k_wg, (dim, dim))   # [out, in] torch layout
    wn_torch = xavier_uniform(k_wn, (dim, dim))
    bg = jnp.full((dim,), -1.0, dtype=jnp.float32)
    bn = jnp.zeros((dim,), dtype=jnp.float32)

    # Pre-transpose so the kernel computes x @ W (== x @ W_torch^T).
    wg = wg_torch.T
    wn = wn_torch.T

    # Fuse params once (hoisted out of the forward path), then run the kernel.
    params = fuse_highway_params(wg, bg, wn, bn)
    out = highway_forward(x, params)
    out = jax.block_until_ready(out)

    # f32 reference (kernel uses bf16 MXU operands -> loosened tolerance).
    gate = jax.nn.sigmoid(x @ wg + bg)
    nlin = jnp.tanh(x @ wn + bn)
    ref = gate * nlin + (1.0 - gate) * x
    assert jnp.allclose(out, ref, atol=3e-2, rtol=3e-2), "mismatch vs f32 reference"

    # Tighter check against a reference mirroring the kernel's bf16 matmul path.
    pre_g = jnp.dot(x.astype(jnp.bfloat16), wg.astype(jnp.bfloat16),
                    preferred_element_type=jnp.float32) + bg
    pre_n = jnp.dot(x.astype(jnp.bfloat16), wn.astype(jnp.bfloat16),
                    preferred_element_type=jnp.float32) + bn
    ref_bf = x + jax.nn.sigmoid(pre_g) * (jnp.tanh(pre_n) - x)
    assert jnp.allclose(out, ref_bf, atol=5e-3, rtol=5e-3), "mismatch vs bf16-path reference"

    print("KERNEL_OK")
</pallas_src>

<mosaic_0001>
module attributes {stable_mosaic.version = 11 : i64} {
  func.func @kernel(%arg0: i32, %arg1: i32, %arg2: memref<8x32xf32, #tpu.memory_space<vmem>>, %arg3: memref<32x256xbf16, #tpu.memory_space<vmem>>, %arg4: memref<1x256xf32, #tpu.memory_space<vmem>>, %arg5: memref<8x32xf32, #tpu.memory_space<vmem>>) attributes {dimension_semantics = [#tpu.dimension_semantics<parallel>, #tpu.dimension_semantics<parallel>], iteration_bounds = array<i64: 2, 1>, scalar_prefetch = 0 : i64, scratch_operands = 0 : i64, tpu.core_type = #tpu.core_type<tc>, window_params = [{transform_indices = @transform_0, window_bounds = array<i64: 8, 32>}, {pipeline_mode = #tpu.pipeline_mode<synchronous>, transform_indices = @transform_1, window_bounds = array<i64: 32, 256>}, {pipeline_mode = #tpu.pipeline_mode<synchronous>, transform_indices = @transform_2, window_bounds = array<i64: 1, 256>}, {transform_indices = @transform_3, window_bounds = array<i64: 8, 32>}]} {
    %c0 = arith.constant 0 : index
    %c0_0 = arith.constant 0 : index
    %0 = vector.load %arg2[%c0, %c0_0] : memref<8x32xf32, #tpu.memory_space<vmem>>, vector<8x32xf32>
    %1 = arith.truncf %0 : vector<8x32xf32> to vector<8x32xbf16>
    %c0_1 = arith.constant 0 : index
    %c0_2 = arith.constant 0 : index
    %2 = vector.load %arg3[%c0_1, %c0_2] : memref<32x256xbf16, #tpu.memory_space<vmem>>, vector<32x256xbf16>
    %cst = arith.constant dense<0.000000e+00> : vector<8x256xf32>
    %3 = tpu.matmul %1, %2, %cst {dimension_numbers = #tpu.dot_dimension_numbers<[1], [0], [0], [1], [0, 0, 1, 1], [], []>} : vector<8x32xbf16>, vector<32x256xbf16>, vector<8x256xf32> -> vector<8x256xf32>
    %c0_3 = arith.constant 0 : index
    %c0_4 = arith.constant 0 : index
    %4 = vector.load %arg4[%c0_3, %c0_4] : memref<1x256xf32, #tpu.memory_space<vmem>>, vector<1x256xf32>
    %5 = vector.broadcast %4 : vector<1x256xf32> to vector<8x256xf32>
    %6 = arith.addf %3, %5 : vector<8x256xf32>
    %7 = vector.extract_strided_slice %6 {offsets = [0, 0], sizes = [8, 32], strides = [1, 1]} : vector<8x256xf32> to vector<8x32xf32>
    %8 = vector.extract_strided_slice %6 {offsets = [0, 128], sizes = [8, 32], strides = [1, 1]} : vector<8x256xf32> to vector<8x32xf32>
    %cst_5 = arith.constant 5.000000e-01 : f32
    %9 = vector.broadcast %cst_5 : f32 to vector<8x32xf32>
    %10 = arith.mulf %9, %7 : vector<8x32xf32>
    %11 = math.tanh %10 : vector<8x32xf32>
    %cst_6 = arith.constant 5.000000e-01 : f32
    %12 = vector.broadcast %cst_6 : f32 to vector<8x32xf32>
    %13 = arith.mulf %12, %11 : vector<8x32xf32>
    %cst_7 = arith.constant 5.000000e-01 : f32
    %14 = vector.broadcast %cst_7 : f32 to vector<8x32xf32>
    %15 = arith.addf %13, %14 : vector<8x32xf32>
    %16 = math.tanh %8 : vector<8x32xf32>
    %17 = arith.subf %16, %0 : vector<8x32xf32>
    %18 = arith.mulf %15, %17 : vector<8x32xf32>
    %19 = arith.addf %0, %18 : vector<8x32xf32>
    %c0_8 = arith.constant 0 : index
    %c0_9 = arith.constant 0 : index
    %20 = vector.load %arg5[%c0_8, %c0_9] : memref<8x32xf32, #tpu.memory_space<vmem>>, vector<8x32xf32>
    tpu.vector_store %arg5[%c0_8, %c0_9], %19 {strides = array<i32>} : memref<8x32xf32, #tpu.memory_space<vmem>>, vector<8x32xf32>,
    return
  }
  func.func @transform_0(%arg0: i32, %arg1: i32) -> (i32, i32) {
    %c0_i32 = arith.constant 0 : i32
    %c0_i32_0 = arith.constant 0 : i32
    return %arg0, %c0_i32 : i32, i32
  }
  func.func @transform_1(%arg0: i32, %arg1: i32) -> (i32, i32) {
    %c0_i32 = arith.constant 0 : i32
    %c0_i32_0 = arith.constant 0 : i32
    return %c0_i32, %arg1 : i32, i32
  }
  func.func @transform_2(%arg0: i32, %arg1: i32) -> (i32, i32) {
    %c0_i32 = arith.constant 0 : i32
    %c0_i32_0 = arith.constant 0 : i32
    return %c0_i32, %arg1 : i32, i32
  }
  func.func @transform_3(%arg0: i32, %arg1: i32) -> (i32, i32) {
    %c0_i32 = arith.constant 0 : i32
    return %arg0, %arg1 : i32, i32
  }
}

</mosaic_0001>

<bundles_post_ra>
// kernel: tpu_custom_call.1
= control target key start
LH: loop header
LB: loop body
LE: loop exit
PB: predicated region body
PF: predicated region fallthrough
CT: control target
= control target key end

     0   :  { %8 = vsyncpa [#allocation3], 0  ;;  %s903_s0 = inlined_call_operand.hbm [shape: f32[16,32], index: 0, kind: input, shape index: {}]   ;;  %s904_s1 = inlined_call_operand.hbm [shape: bf16[32,256], index: 1, kind: input, shape index: {}]   ;;  %s905_s2 = inlined_call_operand.vmem [shape: f32[1,256], index: 2, kind: input, shape index: {}]   ;;  %s906_s3 = inlined_call_operand.hbm [shape: f32[16,32], index: 3, kind: output, shape index: {}]  }
   0x1   :  { %10 = vsyncpa [#allocation3 + $0x1], 0 }
   0x2   :  { %11 = vsyncpa [#allocation6], 0 }
   0x3   :  { %12 = vsyncpa [#allocation4], 0 }
   0x4   :  { %14 = vsyncpa [#allocation4 + $0x1], 0  ;;  %s727_s12 = smov 0   ;;  %s729_s13 = smov 0  }
   0x5   :  { %s731_s14 = smov 0   ;;  %s733_s15 = smov 0  }
   0x6   :  { %s735_s16 = smov 0   ;;  %s737_s17 = smov 0  }
   0x7 LB: > { %s454_s18 = sadd.s32 4294967295, %s699_s17   ;;  %s455_s19 = sadd.s32 4294967294, %s699_s17   ;;  %s699_s17 = sphi %s737_s17, %s20_s17   ;;  %s695_s16 = sphi %s735_s16, %s924_s16   ;;  %s691_s15 = sphi %s733_s15, %s923_s15   ;;  %s687_s14 = sphi %s731_s14, %s922_s14   ;;  %s683_s13 = sphi %s729_s13, %s921_s13   ;;  %s679_s12 = sphi %s727_s12, %s920_s12  }
   0x8   : > { %p52_p0 = scmp.ne.s32.totalorder %s683_s13, %s679_s12  ;;  %p761_p1 = scmp.eq.s32.totalorder %s454_s18, 0 }
   0x9   : > { %p765_p2 = scmp.eq.s32.totalorder %s454_s18, 1  ;;  %p136_p3 = scmp.eq.s32.totalorder %s455_s19, 1 }
   0xa   : > { %p771_p4 = por %p761_p1, %p52_p0  ;;  %p456_p5 = scmp.ge.s32.totalorder %s699_s17, 1 }
   0xb   : > { %p776_p6 = por %p136_p3, %p52_p0  ;;  %p143_p7 = scmp.lt.s32.totalorder %s699_s17, 3 }
   0xc   : > { %s910_s22 = scalar_select %p771_p4, 1, 0 }
   0xd   : > { %s911_s23 = scalar_select %p776_p6, 1, 0 }
   0xe   : > { %p781_p8 = pnand %p456_p5, %p143_p7  ;;  %s701_s25 = smov [#allocation5]  }
   0xf   : > { %s158_s26 = sshll.u32 %s701_s25, 4  ;;  %s32_s28 = sadd.s32 1, %s695_s16  ;;  %s159_s26 = int_to_ptr.vmem [resolvable:$true] %s158_s26 }
  0x10   : > { %p483_p9 = pneg %p781_p8  ;;  %s572_s29 = scalar_lea.vmem %s159_s26, 512 }
  0x11   : > { %p573_p13 = scmp.ne.s32.totalorder %s159_s26, %s572_s29  ;;  %p580_p5 = scmp.lt.s32.totalorder %s159_s26, %s159_s26 }
  0x12   : > { %p790_p11 = pnand %p483_p9, %p761_p1  ;;  %p581_p7 = scmp.lt.s32.totalorder %s572_s29, %s572_s29 }
  0x14   : > { %p563_p12 = pneg %p790_p11  ;;  %p582_p6 = por %p581_p7, %p580_p5 }
  0x16   : > { %p575_p0 = pnand %p573_p13, %p563_p12 }
  0x18   : > { %p576_p3 = pneg %p575_p0 }
  0x1a   : > { %p583_p4 = pnand %p582_p6, %p576_p3 }
  0x1c   : > { %586 = shalt.err (!%p583_p4)
}
  0x1d   : > { %s702_s30 = smov 128   ;;  %s703_s4 = smov 8  }
  0x1e   : > { %486 = dma.hbm_to_vmem [thread:$0]  (!%p790_p11), %s904_s1, 512, %s159_s26, [#allocation6], %s702_s30, %s702_s30, %s703_s4  }
  0x1f   : > { %p34_p6 = scmp.ge.s32.totalorder %s32_s28, 2  ;;  %s39_s7 = sadd.s32 1, %s687_s14 }
  0x20   : > { %p46_p4 = scmp.ne.s32.totalorder %s687_s14, %s683_s13  ;;  %p47_p9 = scmp.eq.s32.totalorder %s699_s17, 0 }
  0x21   : > { %s926_s28 = smov (%p34_p6, %s32_s28), 0  ;;  %p496_p0 = scmp.lt.s32.totalorder %s699_s17, 2 }
  0x22   : > { %p808_p12 = por %p47_p9, %p46_p4  ;;  %p814_p13 = por %p765_p2, %p46_p4 }
  0x23   : > { %s36_s10 = ssub.s32 %s695_s16, %s926_s28  ;;  %s180_s11 = sand.u32 1, %s687_s14  }
  0x24   : > { %p37_p11 = scmp.eq.s32.totalorder %s36_s10, 0  ;;  %s460_s18 = sshll.u32 %s180_s11, 3 }
  0x25   : > { %s461_s25 = sshll.u32 %s695_s16, 7  ;;  %s184_s30 = scalar_lea.vmem [#allocation2], %s460_s18 }
  0x26   : > { %s823_s19 = scalar_select %p37_p11, %s687_s14, %s39_s7  }
  0x27   : > { %s189_s29 = scalar_lea.hbm %s903_s0, %s461_s25  ;;  %s191_s4 = sshll.u32 %s184_s30, 4  ;;  %s192_s4 = int_to_ptr.vmem [resolvable:$true] %s191_s4 }
  0x28   : > { %p831_p2 = pnand %p496_p0, %p808_p12  ;;  %s181_s5 = scalar_lea.sflag [#allocation3], %s180_s11 }
  0x29   : > { %s600_s6 = scalar_lea.vmem %s192_s4, 128  ;;  %s704_s7 = smov [#allocation2]  }
  0x2a   : > { %p589_p3 = pneg %p831_p2  ;;  %p601_p5 = scmp.ne.s32.totalorder %s192_s4, %s600_s6 }
  0x2b   : > { %s605_s10 = sshll.u32 %s704_s7, 4  ;;  %s606_s10 = int_to_ptr.vmem [resolvable:$false] %s605_s10 }
  0x2c   : > { %p603_p7 = pnand %p601_p5, %p589_p3  ;;  %s607_s25 = scalar_lea.vmem %s606_s10, 256 }
  0x2d   : > { %p608_p4 = scmp.lt.s32.totalorder %s192_s4, %s606_s10  ;;  %p609_p9 = scmp.lt.s32.totalorder %s607_s25, %s600_s6 }
  0x2e   : > { %p604_p6 = pneg %p603_p7 }
  0x2f   : > { %p610_p11 = por %p609_p9, %p608_p4 }
  0x31   : > { %p611_p10 = pnand %p610_p11, %p604_p6 }
  0x33   : > { %614 = shalt.err (!%p611_p10)
}
  0x34   : > { %490 = dma.hbm_to_vmem [thread:$0]  (!%p831_p2), %s189_s29, 128, %s192_s4, %s181_s5  }
  0x35   : > { %200 = sbr.rel (%p781_p8) target bundleno = 302 (0x12e), region = 32  ;;  %s842_s8 = sand.u32 (!%p781_p8), 1, %s683_s13  }
  0x36   : > { %s463_s11 = sshll.u32 (!%p781_p8), %s842_s8, 3  ;;  %s203_s18 = scalar_lea.sflag (!%p781_p8), [#allocation3], %s842_s8 }
  0x37   : > { %s206_s26 = scalar_lea.vmem (!%p781_p8), [#allocation2], %s463_s11  ;;  %p917_p12 = scmp.ne.s32.totalorder (!%p781_p8), %s910_s22, 0 }
  0x3a   : > { %666 = dma.done.wait (%p917_p12), %s203_s18, 128  }
  0x3b   : > { %668 = vsyncadd (%p917_p12), %s203_s18, 4294967168 }
  0x3c   : > { %670 = dma.done.wait (%p761_p1), [#allocation6], 512  }
  0x3d   : > { %672 = vsyncadd (%p761_p1), [#allocation6], 4294966784  ;;  %v705_v0 = vmov 0   ;;  %v551_v1 = vld [vmem:[#allocation5 + $0x14] ss:$8 sps:$4 sm:$0xff]   ;;  %vm282_vm0 = vcmask 261120   ;;  %v252_v7 = vlaneseq }
  0x3e   : > { %318 = vmatprep.mubr.bf16.mxu0 %v705_v0  ;;  %v553_v2 = vld [vmem:[#allocation5 + $0x10] ss:$8 sps:$4 sm:$0xff]   ;;  %298 = vmatprep.subr.bf16.mxu0 %v551_v1  ;;  %v554_v3 = vld [vmem:[#allocation5 + $0x4] ss:$8 sps:$4 sm:$0xff]   ;;  %v556_v4 = vld [vmem:[#allocation5] ss:$8 sps:$4 sm:$0xff]  }
  0x3f   : > { %299 = vmatpush1.bf16.msra.mxu0 %v553_v2  ;;  %v244_v5 = vld [vmem:[%s206_s26] sm:$0xff]  ;;  %v253_v8 = vshrl.u32 %v252_v7, 7  ;;  %s472_s24 = sshll.u32 %s691_s15, 7  ;;  %s236_s27 = scalar_lea.vmem [#allocation7], %s463_s11 }
  0x40   : > { %300 = vmatprep.subr.bf16.mxu0 %v554_v3  ;;  %v245_v6 = vpack.c.bf16 %v244_v5, %v244_v5  ;;  %v250_v10 = vld [vmem:[%s905_s2] sm:$0x3]  ;;  %s351_s29 = sshll.u32 %s236_s27, 4  ;;  %s349_s21 = scalar_lea.hbm %s906_s3, %s472_s24  ;;  %s352_s29 = int_to_ptr.vmem [resolvable:$true] %s351_s29 }
  0x41   : > { %v254_v9 = vsub.s32 0, %v253_v8  ;;  %v258_v11 = vsub.s32 1, %v253_v8  ;;  %s337_s5 = scalar_lea.sflag [#allocation4], %s842_s8  ;;  %s615_s6 = scalar_lea.vmem %s352_s29, 128 }
  0x42   : > { %p616_p1 = scmp.ne.s32.totalorder %s352_s29, %s615_s6  ;;  %s706_s7 = smov [#allocation7]  }
  0x43   : > { %301 = vmatpush1.bf16.msra.mxu0 %v556_v4  ;;  %v255_v12 = vrot.slane %v250_v10, %v254_v9  ;;  %v259_v13 = vrot.slane %v250_v10, %v258_v11  ;;  %s619_s15 = sshll.u32 %s706_s7, 4  ;;  %s620_s15 = int_to_ptr.vmem [resolvable:$false] %s619_s15 }
  0x44   : > { %p617_p8 = pnand %p616_p1, %p814_p13  ;;  %s621_s10 = scalar_lea.vmem %s620_s15, 256 }
  0x45   : > { %p622_p0 = scmp.lt.s32.totalorder %s352_s29, %s620_s15  ;;  %p623_p2 = scmp.lt.s32.totalorder %s621_s10, %s615_s6 }
  0x46   : > { %470 = vmatmul.mubr.msk.bf16.vlgmr.msra.gmra.mxu0 %vm282_vm0, %v245_v6  ;;  %p618_p10 = pneg %p617_p8 }
  0x47   : > { %p624_p3 = por %p623_p2, %p622_p0 }
  0x49   : > { %p625_p5 = pnand %p624_p3, %p618_p10 }
 0x106   : > { %v320_v14 = vpop.f32.mrf.mxu0 }
 0x107   : > { %v321_v15 = vadd.f32 %v320_v14, %v255_v12 }
 0x108   : > { %v322_v16 = vpop.f32.mrf.mxu0 }
 0x109   : > { %v327_v17 = vmul.f32 0.5, %v321_v15  ;;  %v323_v18 = vadd.f32 %v322_v16, %v259_v13 }
 0x10a   : > { %v324_v19 = vpop.f32.mrf.mxu0 }
 0x10b   : > { %557 = vtanh.f32 %v327_v17 }
 0x10c   : > { %559 = vtanh.f32 %v323_v18  ;;  %v325_v20 = vpop.f32.mrf.mxu0 }
 0x118   : > { %v558_v21 = vpop.eup %557 }
 0x119   : > { %v560_v22 = vpop.eup %559  ;;  %v329_v23 = vmul.f32 0.5, %v558_v21 }
 0x11a   : > { %v332_v25 = vsub.f32 %v560_v22, %v244_v5 }
 0x11b   : > { %v330_v24 = vadd.f32 0.5, %v329_v23 }
 0x11d   : > { %v333_v26 = vmul.f32 %v332_v25, %v330_v24 }
 0x11f   : > { %v334_v27 = vadd.f32 %v333_v26, %v244_v5 }
 0x121   : > { %335 = vst.msk [vmem:[%s236_s27] sm:$0xff] %vm282_vm0, %v334_v27 }
 0x122   : > { %628 = shalt.err (!%p625_p5)
}
 0x123   : > { %s629_s25 = scalar_lea.hbm %s349_s21, 128  ;;  %s633_s18 = scalar_lea.hbm %s906_s3, 256 }
 0x124   : > { %p630_p7 = scmp.ne.s32.totalorder %s349_s21, %s629_s25  ;;  %p634_p9 = scmp.lt.s32.totalorder %s349_s21, %s906_s3 }
 0x125   : > { %p635_p11 = scmp.lt.s32.totalorder %s633_s18, %s629_s25 }
 0x126   : > { %p631_p6 = pnand %p630_p7, %p814_p13 }
 0x127   : > { %p636_p12 = por %p635_p11, %p634_p9 }
 0x128   : > { %p632_p4 = pneg %p631_p6 }
 0x12a   : > { %p637_p1 = pnand %p636_p12, %p632_p4 }
 0x12c   : > { %640 = shalt.err (!%p637_p1)
}
 0x12d   : > { %481 = dma.vmem_to_hbm [thread:$0]  (%p814_p13), %s352_s29, 128, %s349_s21, %s337_s5  }
 0x12e PF: > { %s363_s22 = sand.u32 1, %s679_s12   ;;  %p918_p8 = scmp.ne.s32.totalorder %s911_s23, 0 }
 0x12f   : > { %p919_p10 = scmp.ge.s32.totalorder %s699_s17, 2  ;;  %s364_s24 = scalar_lea.sflag [#allocation4], %s363_s22 }
 0x131   : > { %p492_p0 = pnand %p919_p10, %p918_p8 }
 0x133   : > { %p493_p2 = pneg %p492_p0 }
 0x135   : > { %674 = dma.done.wait (%p493_p2), %s364_s24, 128  }
 0x136   : > { %676 = vsyncadd (%p493_p2), %s364_s24, 4294967168  ;;  %s20_s17 = sadd.s32 1, %s699_s17   ;;  %s920_s12 = smov %s683_s13 }
 0x137   : > { %p17_p3 = scmp.ge.s32.totalorder %s20_s17, 4   ;;  %s921_s13 = smov %s687_s14 }
 0x138   : > { %s922_s14 = smov %s823_s19  ;;  %s923_s15 = smov %s695_s16 }
 0x139   : > { %s924_s16 = smov %s926_s28  ;;  %19 = sbr.rel (!%p17_p3) target bundleno = 7 (0x7), region = 85 }
 0x13e   :  { %369 = vsyncpa [#allocation3], 1 }
 0x13f   :  { %371 = vsyncpa [#allocation3 + $0x1], 1 }
 0x140   :  { %372 = vsyncpa [#allocation6], 1 }
 0x141   :  { %373 = vsyncpa [#allocation4], 1 }
 0x142   :  { %375 = vsyncpa [#allocation4 + $0x1], 1 }

</bundles_post_ra>
